<compile_context>
chip_gen: v6e
topology: v6e:2x2x1
jax: 0.10.0
libtpu: 0.0.40
codegen_flags: <defaults>
</compile_context>

<pallas_src>
import functools

import jax
import jax.numpy as jnp
from jax.experimental import pallas as pl
from jax.experimental.pallas import tpu as pltpu

# Class names / per-class gamma, exactly as in the PyTorch module.
CLASS_NAMES = [
    "asteroid", "black_hole", "comet", "constellation",
    "galaxy", "nebula", "planet", "star",
]
GAMMA_TABLE = {
    "asteroid": 2.0, "black_hole": 2.0, "comet": 2.0, "constellation": 3.0,
    "galaxy": 2.0, "nebula": 2.0, "planet": 2.0, "star": 2.0,
}
NUM_CLASSES = len(CLASS_NAMES)
GAMMA_VALS = tuple(float(GAMMA_TABLE[name]) for name in CLASS_NAMES)

# 65536 lanes -> (8, 65536) f32 logits tile = 2 MiB.  Good default on
# v5e/v6e/v7x; v6e can push to ~131072 via the tile_lanes argument.
_DEFAULT_TILE_LANES = 65536


def _round_up(x, m):
    return (x + m - 1) // m * m


def _focal_loss_kernel(n_valid_ref, x_ref, t_ref, out_ref, *,
                       tile_lanes, gammas, alpha):
    """One tile of samples (lane axis) -> one 128-lane partial-sum slot.

    n_valid_ref: (1,)     int32 SMEM scalar (number of valid samples)
    x_ref:       (C, T)   logits (f32 or bf16; upcast in VMEM)
    t_ref:       (1, T)   int32 target class indices (lane-dense)
    out_ref:     (1, 128) f32 partial focal-loss sum for this tile
    """
    i = pl.program_id(0)
    n_valid = n_valid_ref[0]

    x = x_ref[...].astype(jnp.float32)                       # (C, T)
    t = t_ref[...]                                           # (1, T)
    c = x.shape[0]

    # One-hot over the class axis (sublanes) — VPU compares only.
    cls_ids = jax.lax.broadcasted_iota(jnp.int32, x.shape, 0)
    onehot = cls_ids == t                                     # (C, T)

    # Numerically stable softmax pieces over the C=8 sublanes.
    m = jnp.max(x, axis=0, keepdims=True)                     # (1, T)
    e = jnp.exp(x - m)                                        # (C, T) 8 exp/sample
    sum_e = jnp.sum(e, axis=0, keepdims=True)                 # (1, T)
    logit_t = jnp.sum(jnp.where(onehot, x, 0.0), axis=0, keepdims=True)
    sel_e = jnp.sum(jnp.where(onehot, e, 0.0), axis=0, keepdims=True)

    ce = (jnp.log(sum_e) + m) - logit_t                       # exact CE, (1, T)
    # Reuse exp(x-m): pt = softmax prob of the target class (no extra exp).
    pt = sel_e * pl.reciprocal(sum_e, approx=True)

    one_minus_pt = jnp.maximum(1.0 - pt, 0.0)
    if set(gammas) <= {2.0, 3.0}:
        # (1-pt)^2, times an extra (1-pt) where the target's gamma is 3.
        mod = one_minus_pt * one_minus_pt
        g3 = [k for k, g in enumerate(gammas) if g == 3.0]
        if g3:
            is_g3 = t == g3[0]
            for k in g3[1:]:
                is_g3 = jnp.logical_or(is_g3, t == k)
            mod = mod * jnp.where(is_g3, one_minus_pt, 1.0)
    else:
        gamma_col = jnp.asarray(gammas, jnp.float32).reshape(c, 1)
        gamma_t = jnp.sum(jnp.where(onehot, gamma_col, 0.0), axis=0,
                          keepdims=True)
        mod = jnp.power(one_minus_pt, gamma_t)

    focal = mod * ce                                          # (1, T)

    if alpha is not None:  # static per-class weights, baked as constants
        alpha_col = jnp.asarray(alpha, jnp.float32).reshape(c, 1)
        alpha_t = jnp.sum(jnp.where(onehot, alpha_col, 0.0), axis=0,
                          keepdims=True)
        focal = alpha_t * focal

    tile_start = i * tile_lanes
    fully_valid = (tile_start + tile_lanes) <= n_valid

    @pl.when(fully_valid)
    def _full_tile():
        out_ref[...] = jnp.full((1, 128), jnp.sum(focal), jnp.float32)

    @pl.when(jnp.logical_not(fully_valid))
    def _boundary_tile():
        lane = jax.lax.broadcasted_iota(jnp.int32, focal.shape, 1)
        masked = jnp.where(tile_start + lane < n_valid, focal, 0.0)
        out_ref[...] = jnp.full((1, 128), jnp.sum(masked), jnp.float32)


def focal_loss_class_major(logits_cm, targets, *, n_valid=None, alpha=None,
                           reduction="mean", tile_lanes=None):
    """Fast path: logits class-major (C, N) — classes on sublanes, samples on
    lanes — so no relayout pass over the logits is required."""
    c, n = logits_cm.shape
    assert c == NUM_CLASSES
    if reduction not in ("mean", "sum"):
        # TODO(synk): reduction='none' needs a per-sample (1, N) output.
        raise NotImplementedError("reduction must be 'mean' or 'sum'")
    if n == 0:
        return jnp.asarray(float("nan") if reduction == "mean" else 0.0,
                           jnp.float32)
    if n_valid is None:
        n_valid = n

    if tile_lanes is None:
        tile_lanes = min(_DEFAULT_TILE_LANES, _round_up(n, 128))
    tile_lanes = max(128, _round_up(int(tile_lanes), 128))
    num_tiles = (n + tile_lanes - 1) // tile_lanes

    targets_row = targets.astype(jnp.int32).reshape(1, n)    # free reshape
    n_valid_arr = jnp.reshape(jnp.asarray(n_valid, jnp.int32), (1,))

    kernel = functools.partial(
        _focal_loss_kernel, tile_lanes=tile_lanes, gammas=GAMMA_VALS,
        alpha=None if alpha is None else tuple(float(a) for a in alpha))

    itemsize = jnp.dtype(logits_cm.dtype).itemsize
    cost = pl.CostEstimate(
        flops=64 * n,                        # compares/selects/adds, rough
        transcendentals=10 * n,              # 8 exp + 1 log + 1 recip / sample
        bytes_accessed=int(c * n * itemsize + 4 * n + num_tiles * 128 * 4))

    # Double-buffered inputs + ~a dozen tile-sized elementwise temporaries.
    tile_bytes_f32 = c * tile_lanes * 4
    vmem_limit = int(min(max(16 * tile_bytes_f32, 16 << 20), 48 << 20))

    partials = pl.pallas_call(
        kernel,
        out_shape=jax.ShapeDtypeStruct((1, num_tiles * 128), jnp.float32),
        grid_spec=pltpu.PrefetchScalarGridSpec(
            num_scalar_prefetch=1,
            grid=(num_tiles,),
            in_specs=[
                pl.BlockSpec((c, tile_lanes), lambda i, n_ref: (0, i)),
                pl.BlockSpec((1, tile_lanes), lambda i, n_ref: (0, i)),
            ],
            out_specs=pl.BlockSpec((1, 128), lambda i, n_ref: (0, i)),
        ),
        compiler_params=pltpu.CompilerParams(
            dimension_semantics=("parallel",),
            vmem_limit_bytes=vmem_limit),
        cost_estimate=cost,
    )(n_valid_arr, logits_cm, targets_row)

    per_tile = partials.reshape(num_tiles, 128)[:, 0]
    total = jnp.sum(per_tile)
    if reduction == "sum":
        return total
    return total / jnp.asarray(n_valid, jnp.float32)


def focal_loss(inputs, targets, alpha=None, reduction="mean", tile_lanes=None):
    """PyTorch-layout entry point: inputs (N, C), targets (N,).

    TODO(synk): this transpose is a full extra HBM pass over the logits;
    emit logits class-major upstream and call focal_loss_class_major directly.
    """
    n, c = inputs.shape
    assert c == NUM_CLASSES
    return focal_loss_class_major(inputs.T, targets, alpha=alpha,
                                  reduction=reduction, tile_lanes=tile_lanes)


def _focal_loss_ref(inputs, targets):
    """Pure-JAX reference mirroring the PyTorch forward (mean reduction)."""
    logp = jax.nn.log_softmax(inputs.astype(jnp.float32), axis=-1)
    ce = -jnp.take_along_axis(logp, targets[:, None], axis=-1)[:, 0]
    pt = jnp.exp(-ce)
    gamma = jnp.array([GAMMA_TABLE[name] for name in CLASS_NAMES], jnp.float32)
    gamma_t = gamma[targets]
    return jnp.mean((1.0 - pt) ** gamma_t * ce)


if __name__ == "__main__":
    key = jax.random.PRNGKey(0)
    k1, k2 = jax.random.split(key)
    batch = 200
    logits = jax.random.normal(k1, (batch, NUM_CLASSES), dtype=jnp.float32)
    targets = jax.random.randint(k2, (batch,), 0, NUM_CLASSES, dtype=jnp.int32)

    ref = _focal_loss_ref(logits, targets)

    # Class-major fast path, multi-tile with a ragged last tile (grid=2,
    # tiles of 128 lanes; last tile only 72 valid -> masked branch).
    logits_cm = logits.T
    out_tiled = jax.block_until_ready(
        focal_loss_class_major(logits_cm, targets, tile_lanes=128))
    assert jnp.allclose(out_tiled, ref, rtol=2e-3, atol=1e-5), (out_tiled, ref)

    # Default (single-tile) path through the (N, C) compatibility wrapper.
    out_default = jax.block_until_ready(focal_loss(logits, targets))
    assert jnp.allclose(out_default, ref, rtol=2e-3, atol=1e-5), (out_default, ref)

    # bf16 logits path (halves logit HBM traffic; kernel upcasts in VMEM).
    out_bf16 = jax.block_until_ready(
        focal_loss_class_major(logits_cm.astype(jnp.bfloat16), targets))
    assert jnp.allclose(out_bf16, ref, rtol=5e-2, atol=1e-3), (out_bf16, ref)

    print("KERNEL_OK")
</pallas_src>

<mosaic_0001>
module attributes {stable_mosaic.version = 11 : i64} {
  func.func @_focal_loss_kernel(%arg0: i32, %arg1: memref<1xi32, #tpu.memory_space<smem>>, %arg2: memref<8x128xf32, #tpu.memory_space<vmem>>, %arg3: memref<1x128xi32, #tpu.memory_space<vmem>>, %arg4: memref<1x128xf32, #tpu.memory_space<vmem>>) attributes {dimension_semantics = [#tpu.dimension_semantics<parallel>], iteration_bounds = array<i64: 2>, scalar_prefetch = 1 : i64, scratch_operands = 0 : i64, tpu.core_type = #tpu.core_type<tc>, window_params = [{transform_indices = @transform_0, window_bounds = array<i64: 8, 128>}, {transform_indices = @transform_1, window_bounds = array<i64: 1, 128>}, {transform_indices = @transform_2, window_bounds = array<i64: 1, 128>}]} {
    %c0 = arith.constant 0 : index
    %0 = memref.load %arg1[%c0] : memref<1xi32, #tpu.memory_space<smem>>
    %c0_0 = arith.constant 0 : index
    %c0_1 = arith.constant 0 : index
    %1 = vector.load %arg2[%c0_0, %c0_1] : memref<8x128xf32, #tpu.memory_space<vmem>>, vector<8x128xf32>
    %c0_2 = arith.constant 0 : index
    %c0_3 = arith.constant 0 : index
    %2 = vector.load %arg3[%c0_2, %c0_3] : memref<1x128xi32, #tpu.memory_space<vmem>>, vector<1x128xi32>
    %3 = tpu.iota {dimensions = array<i32: 0>} : vector<8x128xi32>
    %4 = vector.broadcast %2 : vector<1x128xi32> to vector<8x128xi32>
    %5 = arith.cmpi eq, %3, %4 : vector<8x128xi32>
    %cst = arith.constant dense<0xFF800000> : vector<128xf32>
    %6 = vector.multi_reduction <maximumf>, %1, %cst [0] : vector<8x128xf32> to vector<128xf32>
    %7 = vector.shape_cast %6 : vector<128xf32> to vector<1x128xf32>
    %8 = vector.broadcast %7 : vector<1x128xf32> to vector<8x128xf32>
    %9 = arith.subf %1, %8 : vector<8x128xf32>
    %10 = math.exp %9 : vector<8x128xf32>
    %cst_4 = arith.constant dense<0.000000e+00> : vector<128xf32>
    %11 = vector.multi_reduction <add>, %10, %cst_4 [0] : vector<8x128xf32> to vector<128xf32>
    %12 = vector.shape_cast %11 : vector<128xf32> to vector<1x128xf32>
    %cst_5 = arith.constant 0.000000e+00 : f32
    %13 = vector.broadcast %cst_5 : f32 to vector<8x128xf32>
    %14 = arith.select %5, %1, %13 : vector<8x128xi1>, vector<8x128xf32>
    %cst_6 = arith.constant dense<0.000000e+00> : vector<128xf32>
    %15 = vector.multi_reduction <add>, %14, %cst_6 [0] : vector<8x128xf32> to vector<128xf32>
    %16 = vector.shape_cast %15 : vector<128xf32> to vector<1x128xf32>
    %cst_7 = arith.constant 0.000000e+00 : f32
    %17 = vector.broadcast %cst_7 : f32 to vector<8x128xf32>
    %18 = arith.select %5, %10, %17 : vector<8x128xi1>, vector<8x128xf32>
    %cst_8 = arith.constant dense<0.000000e+00> : vector<128xf32>
    %19 = vector.multi_reduction <add>, %18, %cst_8 [0] : vector<8x128xf32> to vector<128xf32>
    %20 = vector.shape_cast %19 : vector<128xf32> to vector<1x128xf32>
    %21 = math.log %12 : vector<1x128xf32>
    %22 = arith.addf %21, %7 : vector<1x128xf32>
    %23 = arith.subf %22, %16 : vector<1x128xf32>
    %24 = tpu.reciprocal %12 {approx = true} : vector<1x128xf32> -> vector<1x128xf32>
    %25 = arith.mulf %20, %24 : vector<1x128xf32>
    %cst_9 = arith.constant 1.000000e+00 : f32
    %26 = vector.broadcast %cst_9 : f32 to vector<1x128xf32>
    %27 = arith.subf %26, %25 : vector<1x128xf32>
    %cst_10 = arith.constant 0.000000e+00 : f32
    %28 = vector.broadcast %cst_10 : f32 to vector<1x128xf32>
    %29 = arith.maximumf %27, %28 : vector<1x128xf32>
    %30 = arith.mulf %29, %29 : vector<1x128xf32>
    %c3_i32 = arith.constant 3 : i32
    %31 = vector.broadcast %c3_i32 : i32 to vector<1x128xi32>
    %32 = arith.cmpi eq, %2, %31 : vector<1x128xi32>
    %cst_11 = arith.constant 1.000000e+00 : f32
    %33 = vector.broadcast %cst_11 : f32 to vector<1x128xf32>
    %34 = arith.select %32, %29, %33 : vector<1x128xi1>, vector<1x128xf32>
    %35 = arith.mulf %30, %34 : vector<1x128xf32>
    %36 = arith.mulf %35, %23 : vector<1x128xf32>
    %c128_i32 = arith.constant 128 : i32
    %37 = arith.muli %arg0, %c128_i32 : i32
    %c128_i32_12 = arith.constant 128 : i32
    %38 = arith.addi %37, %c128_i32_12 : i32
    %39 = arith.cmpi sle, %38, %0 : i32
    %40 = arith.extui %39 : i1 to i32
    %c0_i32 = arith.constant 0 : i32
    %41 = arith.cmpi ne, %40, %c0_i32 : i32
    scf.if %41 {
      %45 = vector.shape_cast %36 : vector<1x128xf32> to vector<1x1x128xf32>
      %cst_14 = arith.constant dense<0.000000e+00> : vector<1xf32>
      %46 = vector.multi_reduction <add>, %45, %cst_14 [1, 2] : vector<1x1x128xf32> to vector<1xf32>
      %47 = vector.shape_cast %46 : vector<1xf32> to vector<1x1x1xf32>
      %48 = vector.extract %47[0, 0, 0] : f32 from vector<1x1x1xf32>
      %49 = vector.broadcast %48 : f32 to vector<1x128xf32>
      %c0_15 = arith.constant 0 : index
      %c0_16 = arith.constant 0 : index
      %50 = vector.load %arg4[%c0_15, %c0_16] : memref<1x128xf32, #tpu.memory_space<vmem>>, vector<1x128xf32>
      tpu.vector_store %arg4[%c0_15, %c0_16], %49 {strides = array<i32>} : memref<1x128xf32, #tpu.memory_space<vmem>>, vector<1x128xf32>,
    } else {
    }
    %true = arith.constant true
    %42 = arith.xori %39, %true : i1
    %43 = arith.extui %42 : i1 to i32
    %c0_i32_13 = arith.constant 0 : i32
    %44 = arith.cmpi ne, %43, %c0_i32_13 : i32
    scf.if %44 {
      %45 = tpu.iota {dimensions = array<i32: 1>} : vector<1x128xi32>
      %46 = vector.broadcast %37 : i32 to vector<1x128xi32>
      %47 = arith.addi %46, %45 : vector<1x128xi32>
      %48 = vector.broadcast %0 : i32 to vector<1x128xi32>
      %49 = arith.cmpi slt, %47, %48 : vector<1x128xi32>
      %cst_14 = arith.constant 0.000000e+00 : f32
      %50 = vector.broadcast %cst_14 : f32 to vector<1x128xf32>
      %51 = arith.select %49, %36, %50 : vector<1x128xi1>, vector<1x128xf32>
      %52 = vector.shape_cast %51 : vector<1x128xf32> to vector<1x1x128xf32>
      %cst_15 = arith.constant dense<0.000000e+00> : vector<1xf32>
      %53 = vector.multi_reduction <add>, %52, %cst_15 [1, 2] : vector<1x1x128xf32> to vector<1xf32>
      %54 = vector.shape_cast %53 : vector<1xf32> to vector<1x1x1xf32>
      %55 = vector.extract %54[0, 0, 0] : f32 from vector<1x1x1xf32>
      %56 = vector.broadcast %55 : f32 to vector<1x128xf32>
      %c0_16 = arith.constant 0 : index
      %c0_17 = arith.constant 0 : index
      %57 = vector.load %arg4[%c0_16, %c0_17] : memref<1x128xf32, #tpu.memory_space<vmem>>, vector<1x128xf32>
      tpu.vector_store %arg4[%c0_16, %c0_17], %56 {strides = array<i32>} : memref<1x128xf32, #tpu.memory_space<vmem>>, vector<1x128xf32>,
    } else {
    }
    return
  }
  func.func @transform_0(%arg0: i32, %arg1: memref<1xi32, #tpu.memory_space<smem>>) -> (i32, i32) {
    %c0_i32 = arith.constant 0 : i32
    %c0_i32_0 = arith.constant 0 : i32
    return %c0_i32, %arg0 : i32, i32
  }
  func.func @transform_1(%arg0: i32, %arg1: memref<1xi32, #tpu.memory_space<smem>>) -> (i32, i32) {
    %c0_i32 = arith.constant 0 : i32
    %c0_i32_0 = arith.constant 0 : i32
    return %c0_i32, %arg0 : i32, i32
  }
  func.func @transform_2(%arg0: i32, %arg1: memref<1xi32, #tpu.memory_space<smem>>) -> (i32, i32) {
    %c0_i32 = arith.constant 0 : i32
    %c0_i32_0 = arith.constant 0 : i32
    return %c0_i32, %arg0 : i32, i32
  }
}

</mosaic_0001>

<bundles_post_ra>
// kernel: tpu_custom_call.1
= control target key start
LH: loop header
LB: loop body
LE: loop exit
PB: predicated region body
PF: predicated region fallthrough
CT: control target
= control target key end

     0   :  { %s713_s0 = inlined_call_operand.<no memory space> [shape: s32[1], index: 0, kind: input, shape index: {}]   ;;  %s714_s1 = inlined_call_operand.hbm [shape: f32[8,200], index: 1, kind: input, shape index: {}]   ;;  %s715_s2 = inlined_call_operand.vmem [shape: s32[1,200], index: 2, kind: input, shape index: {}]   ;;  %s716_s3 = inlined_call_operand.hbm [shape: f32[1,256], index: 3, kind: output, shape index: {}]  }
   0x1   :  { %8 = sst [smem:[#allocation3]] %s713_s0 }
   0x2   :  { %9 = vsyncpa [#allocation5], 0 }
   0x3   :  { %11 = vsyncpa [#allocation5 + $0x1], 0 }
   0x4   :  { %12 = vsyncpa [#allocation6], 0 }
   0x5   :  { %14 = vsyncpa [#allocation6 + $0x1], 0  ;;  %s545_s14 = smov 0   ;;  %s547_s15 = smov 0  }
   0x6   :  { %s549_s16 = smov 0   ;;  %s551_s17 = smov 0  }
   0x7 LB: > { %s566_s0 = sadd.s32 4294967295, %s518_s17   ;;  %s357_s18 = sadd.s32 4294967294, %s518_s17   ;;  %s518_s17 = sphi %s551_s17, %s733_s17   ;;  %s514_s16 = sphi %s549_s16, %s732_s16   ;;  %s510_s15 = sphi %s547_s15, %s731_s15   ;;  %s506_s14 = sphi %s545_s14, %s730_s14  }
   0x8   : > { %s570_s19 = sadd.s32 1, %s518_s17   ;;  %s27_s20 = sadd.s32 1, %s514_s16 }
   0x9   : > { %s24_s21 = ssub.s32 %s518_s17, %s570_s19  ;;  %p34_p0 = scmp.ne.s32.totalorder %s514_s16, %s510_s15 }
   0xa   : > { %p25_p1 = scmp.eq.s32.totalorder %s24_s21, 0  ;;  %p35_p2 = scmp.eq.s32.totalorder %s518_s17, 0 }
   0xb   : > { %p40_p3 = scmp.ne.s32.totalorder %s510_s15, %s506_s14  ;;  %p41_p4 = scmp.eq.s32.totalorder %s566_s0, 0 }
   0xc   : > { %s582_s22 = scalar_select %p25_p1, %s514_s16, %s27_s20  }
   0xd   : > { %p584_p5 = por %p35_p2, %p34_p0  ;;  %p588_p6 = por %p41_p4, %p40_p3 }
   0xe   : > { %p90_p7 = scmp.eq.s32.totalorder %s566_s0, 1  ;;  %p96_p8 = scmp.eq.s32.totalorder %s357_s18, 1 }
   0xf   : > { %s720_s24 = scalar_select %p588_p6, 1, 0 }
  0x10   : > { %p386_p10 = scmp.lt.s32.totalorder %s518_s17, 2  ;;  %p595_p11 = por %p90_p7, %p34_p0 }
  0x11   : > { %p599_p12 = por %p96_p8, %p40_p3  ;;  %s116_s27 = sand.u32 1, %s514_s16  }
  0x12   : > { %s721_s25 = scalar_select %p595_p11, 1, 0 }
  0x13   : > { %s722_s26 = scalar_select %p599_p12, 1, 0 }
  0x14   : > { %s361_s28 = sshll.u32 %s518_s17, 7  ;;  %s360_s29 = sshll.u32 %s116_s27, 3 }
  0x15   : > { %s608_s5 = scalar_lea.hbm %s714_s1, %s361_s28  ;;  %s120_s6 = scalar_lea.vmem [#allocation4], %s360_s29 }
  0x16   : > { %s127_s7 = sshll.u32 %s120_s6, 4  ;;  %p612_p13 = pnand %p386_p10, %p584_p5  ;;  %s616_s7 = int_to_ptr.vmem [resolvable:$true] %s127_s7 }
  0x17   : > { %s117_s9 = scalar_lea.sflag [#allocation5], %s116_s27  ;;  %s426_s10 = scalar_lea.hbm %s608_s5, 128 }
  0x18   : > { %p427_p2 = scmp.ne.s32.totalorder %s608_s5, %s426_s10  ;;  %p428_p3 = pneg %p612_p13 }
  0x19   : > { %s431_s13 = scalar_lea.hbm %s714_s1, 256  ;;  %p432_p5 = scmp.lt.s32.totalorder %s608_s5, %s714_s1 }
  0x1a   : > { %p429_p4 = pnand %p428_p3, %p427_p2  ;;  %p433_p8 = scmp.lt.s32.totalorder %s431_s13, %s426_s10 }
  0x1c   : > { %p430_p7 = pneg %p429_p4  ;;  %p434_p10 = por %p433_p8, %p432_p5 }
  0x1e   : > { %p435_p9 = pnand %p434_p10, %p430_p7 }
  0x20   : > { %438 = shalt.err (!%p435_p9)
}
  0x21   : > { %s439_s21 = scalar_lea.vmem %s616_s7, 128  ;;  %s520_s23 = smov [#allocation4]  }
  0x22   : > { %p440_p0 = scmp.ne.s32.totalorder %s616_s7, %s439_s21  ;;  %s444_s27 = sshll.u32 %s520_s23, 4  ;;  %s445_s27 = int_to_ptr.vmem [resolvable:$false] %s444_s27 }
  0x23   : > { %s446_s28 = scalar_lea.vmem %s445_s27, 256  ;;  %p447_p4 = scmp.lt.s32.totalorder %s616_s7, %s445_s27 }
  0x24   : > { %p442_p1 = pnand %p440_p0, %p428_p3  ;;  %p448_p12 = scmp.lt.s32.totalorder %s446_s28, %s439_s21 }
  0x26   : > { %p443_p2 = pneg %p442_p1  ;;  %p449_p11 = por %p448_p12, %p447_p4 }
  0x28   : > { %p450_p6 = pnand %p449_p11, %p443_p2 }
  0x2a   : > { %453 = shalt.err (!%p450_p6)
}
  0x2b   : > { %381 = dma.hbm_to_vmem [thread:$0]  (!%p612_p13), %s608_s5, 128, %s616_s7, %s117_s9  }
  0x2c   : > { %p724_p9 = scmp.lt.s32.totalorder %s518_s17, 3  ;;  %p725_p7 = scmp.ge.s32.totalorder %s518_s17, 1 }
  0x2e   : > { %p139_p0 = pnand %p725_p7, %p724_p9 }
  0x2f   : > { %s643_s29 = sand.u32 (!%p139_p0), 1, %s510_s15   ;;  %p726_p6 = scmp.ne.s32.totalorder (!%p139_p0), %s720_s24, 0 }
  0x30   : > { %142 = sbr.rel (%p139_p0) target bundleno = 567 (0x237), region = 28  ;;  %s363_s30 = sshll.u32 (!%p139_p0), %s643_s29, 3 }
  0x31   : > { %s145_s4 = scalar_lea.sflag (!%p139_p0), [#allocation5], %s643_s29  ;;  %s148_s6 = scalar_lea.vmem (!%p139_p0), [#allocation4], %s363_s30 }
  0x35   : > { %497 = dma.done.wait (%p726_p6), %s145_s4, 128  }
  0x36   : > { %499 = vsyncadd (%p726_p6), %s145_s4, 4294967168  ;;  %s651_s5 = sld [smem:[#allocation3]]  ;;  %s364_s7 = sshll.u32 %s566_s0, 7  ;;  %v175_v0 = vld [vmem:[%s148_s6] sm:$0xff]  ;;  %v177_v7 = vlaneseq }
  0x37   : > { %s656_s8 = sadd.s32 128, %s364_s7  ;;  %v184_v1 = vrot.slane %v175_v0, 4  ;;  %p171_p11 = scmp.lt.s32.totalorder %s566_s0, 1 }
  0x38   : > { %v178_v10 = vshrl.u32 %v177_v7, 7  ;;  %s665_s12 = scalar_lea.vmem [#allocation7], %s643_s29 }
  0x39   : > { %v185_v2 = vmax.f32 %v175_v0, %v184_v1  ;;  %s172_s24 = scalar_select %p171_p11, %s566_s0, 1 }
  0x3a   : > { %v181_v11 = vsub.s32 0, %v178_v10 }
  0x3b   : > { %v186_v3 = vrot.slane %v185_v2, 2  ;;  %s173_s11 = scalar_lea.vmem %s715_s2, %s172_s24 }
  0x3c   : > { %v176_v12 = vld [vmem:[%s173_s11] sm:$0x1]  ;;  %p365_p12 = scmp.gt.s32.totalorder %s656_s8, %s651_s5 }
  0x3d   : > { %v187_v4 = vmax.f32 %v185_v2, %v186_v3  ;;  %v182_v13 = vrot.slane %v176_v12, %v181_v11  ;;  %vm222_vm1 = vcmp.eq.s32.totalorder %v176_v12, 3 }
  0x3f   : > { %v188_v5 = vrot.slane %v187_v4, 1  ;;  %vm183_vm0 = vcmp.eq.s32.totalorder %v178_v10, %v182_v13 }
  0x40   : > { %v199_v21 = vsel %vm183_vm0, %v175_v0, 0.0 }
  0x41   : > { %v189_v6 = vmax.f32 %v187_v4, %v188_v5  ;;  %v200_v24 = vrot.slane %v199_v21, 4 }
  0x43   : > { %v190_v8 = vsub.f32 %v175_v0, %v189_v6  ;;  %v201_v27 = vadd.f32 %v200_v24, %v199_v21 }
  0x45   : > { %v191_v9 = vmul.f32 1.442695, %v190_v8  ;;  %v202_v29 = vrot.slane %v201_v27, 2 }
  0x47   : > { %420 = vpow2.f32 %v191_v9  ;;  %v203_v31 = vadd.f32 %v202_v29, %v201_v27 }
  0x49   : > { %v204_v34 = vrot.slane %v203_v31, 1 }
  0x4b   : > { %v205_v38 = vadd.f32 %v204_v34, %v203_v31 }
  0x54   : > { %v421_v14 = vpop.eup %420 }
  0x55   : > { %v193_v15 = vrot.slane %v421_v14, 4  ;;  %v206_v16 = vsel %vm183_vm0, %v421_v14, 0.0 }
  0x56   : > { %v207_v18 = vrot.slane %v206_v16, 4 }
  0x57   : > { %v194_v17 = vadd.f32 %v421_v14, %v193_v15 }
  0x58   : > { %v208_v22 = vadd.f32 %v207_v18, %v206_v16 }
  0x59   : > { %v195_v19 = vrot.slane %v194_v17, 2 }
  0x5a   : > { %v209_v26 = vrot.slane %v208_v22, 2 }
  0x5b   : > { %v196_v20 = vadd.f32 %v195_v19, %v194_v17 }
  0x5c   : > { %v210_v28 = vadd.f32 %v209_v26, %v208_v22 }
  0x5d   : > { %v197_v23 = vrot.slane %v196_v20, 1 }
  0x5e   : > { %v211_v30 = vrot.slane %v210_v28, 1 }
  0x5f   : > { %v198_v25 = vadd.f32 %v197_v23, %v196_v20 }
  0x60   : > { %v212_v32 = vadd.f32 %v211_v30, %v210_v28 }
  0x61   : > { %422 = vlog2.f32 %v198_v25 }
  0x62   : > { %424 = vrcp.f32 %v198_v25 }
  0x6e   : > { %v423_v33 = vpop.eup %422 }
  0x6f   : > { %v425_v35 = vpop.eup %424  ;;  %v214_v36 = vmul.f32 0.6931472, %v423_v33 }
  0x70   : > { %v218_v37 = vmul.f32 %v425_v35, %v212_v32 }
  0x71   : > { %v215_v39 = vadd.f32 %v214_v36, %v189_v6 }
  0x72   : > { %v219_v40 = vsub.f32 1.0, %v218_v37 }
  0x73   : > { %v216_v42 = vsub.f32 %v215_v39, %v205_v38 }
  0x74   : > { %v220_v41 = vmax.f32 %v219_v40, 0.0 }
  0x76   : > { %v221_v43 = vmul.f32 %v220_v41, %v220_v41  ;;  %v223_v44 = vsel %vm222_vm1, %v220_v41, 1.0  ;;  %231 = sbr.rel (%p365_p12) target bundleno = 327 (0x147), region = 36 }
  0x78   : > { %v224_v45 = vmul.f32 %v223_v44, %v221_v43 }
  0x7a   : > { %v225_v46 = vmul.f32 %v224_v45, %v216_v42 }
  0x7b   : > { %vm232_vm2 = vcmask 1040384  }
  0x7c   : > { %v233_v47 = vsel %vm232_vm2, %v225_v46, 0.0 }
  0x7d   : > { %234 = vadd.xlane.f32.xlu0 %v233_v47 }
 0x106   : > { %v235_v48 = vpop.xlane.xlu0 %234 }
 0x107   : > { %v236_v49 = vrot.slane %v235_v48, 4 }
 0x109   : > { %v237_v50 = vadd.f32 %v236_v49, %v235_v48 }
 0x10b   : > { %v238_v51 = vrot.slane %v237_v50, 2 }
 0x10d   : > { %v239_v52 = vadd.f32 %v238_v51, %v237_v50 }
 0x10f   : > { %v240_v53 = vrot.slane %v239_v52, 1 }
 0x111   : > { %v241_v54 = vadd.f32 %v240_v53, %v239_v52 }
 0x113   : > { %370 = vpush %v241_v54 }
 0x144   : > { %s371_s13 = spop %370 }
 0x145   : > { %v243_v55 = vstv %s371_s13 }
 0x146   : > { %244 = vst [vmem:[%s665_s12] sm:$0x1] %v243_v55 }
 0x147 PF: > { %p366_p13 = scmp.le.s32.totalorder %s656_s8, %s651_s5 }
 0x149   : > { %248 = sbr.rel (%p366_p13) target bundleno = 543 (0x21f), region = 40 }
 0x14e   : > { %v250_v56 = vand.u32 127, %v177_v7  ;;  %v251_v57 = vstv %s364_s7  ;;  %v253_v58 = vstv %s651_s5  ;;  %vm256_vm3 = vcmask 1040384  }
 0x150   : > { %v252_v59 = vadd.s32 %v251_v57, %v250_v56 }
 0x152   : > { %vm254_vm4 = vcmp.lt.s32.totalorder %v252_v59, %v253_v58 }
 0x153   : > { %v255_v60 = vsel %vm254_vm4, %v225_v46, 0.0 }
 0x154   : > { %v257_v61 = vsel %vm256_vm3, %v255_v60, 0.0 }
 0x155   : > { %258 = vadd.xlane.f32.xlu0 %v257_v61 }
 0x1de   : > { %v259_v62 = vpop.xlane.xlu0 %258 }
 0x1df   : > { %v260_v63 = vrot.slane %v259_v62, 4 }
 0x1e1   : > { %v261_v0 = vadd.f32 %v260_v63, %v259_v62 }
 0x1e3   : > { %v262_v1 = vrot.slane %v261_v0, 2 }
 0x1e5   : > { %v263_v2 = vadd.f32 %v262_v1, %v261_v0 }
 0x1e7   : > { %v264_v3 = vrot.slane %v263_v2, 1 }
 0x1e9   : > { %v265_v4 = vadd.f32 %v264_v3, %v263_v2 }
 0x1eb   : > { %372 = vpush %v265_v4 }
 0x21c   : > { %s373_s18 = spop %372 }
 0x21d   : > { %v267_v5 = vstv %s373_s18 }
 0x21e   : > { %268 = vst [vmem:[%s665_s12] sm:$0x1] %v267_v5 }
 0x21f PF: > { %s367_s20 = sshll.u32 %s566_s0, 4  ;;  %s282_s28 = sshll.u32 %s665_s12, 4  ;;  %s283_s28 = int_to_ptr.vmem [resolvable:$true] %s282_s28 }
 0x220   : > { %s280_s27 = scalar_lea.hbm %s716_s3, %s367_s20  ;;  %s270_s30 = scalar_lea.sflag [#allocation6], %s643_s29 }
 0x221   : > { %s454_s4 = scalar_lea.vmem %s283_s28, 16  ;;  %p727_p3 = scmp.ne.s32.totalorder %s721_s25, 0 }
 0x222   : > { %p455_p1 = scmp.ne.s32.totalorder %s283_s28, %s454_s4  ;;  %s521_s6 = smov [#allocation7]  }
 0x223   : > { %s458_s5 = sshll.u32 %s521_s6, 4  ;;  %s459_s5 = int_to_ptr.vmem [resolvable:$false] %s458_s5 }
 0x224   : > { %p456_p5 = pnand %p455_p1, %p727_p3  ;;  %s460_s7 = scalar_lea.vmem %s459_s5, 32 }
 0x225   : > { %p461_p10 = scmp.lt.s32.totalorder %s283_s28, %s459_s5  ;;  %p462_p2 = scmp.lt.s32.totalorder %s460_s7, %s454_s4 }
 0x226   : > { %p457_p8 = pneg %p456_p5 }
 0x227   : > { %p463_p4 = por %p462_p2, %p461_p10 }
 0x229   : > { %p464_p9 = pnand %p463_p4, %p457_p8 }
 0x22b   : > { %467 = shalt.err (!%p464_p9)
}
 0x22c   : > { %s468_s0 = scalar_lea.hbm %s280_s27, 16  ;;  %s472_s24 = scalar_lea.hbm %s716_s3, 32 }
 0x22d   : > { %p469_p7 = scmp.ne.s32.totalorder %s280_s27, %s468_s0  ;;  %p473_p11 = scmp.lt.s32.totalorder %s280_s27, %s716_s3 }
 0x22e   : > { %p474_p12 = scmp.lt.s32.totalorder %s472_s24, %s468_s0 }
 0x22f   : > { %p470_p0 = pnand %p469_p7, %p727_p3 }
 0x230   : > { %p475_p13 = por %p474_p12, %p473_p11 }
 0x231   : > { %p471_p6 = pneg %p470_p0 }
 0x233   : > { %p476_p1 = pnand %p475_p13, %p471_p6 }
 0x235   : > { %479 = shalt.err (!%p476_p1)
}
 0x236   : > { %376 = dma.vmem_to_hbm [thread:$0]  (%p727_p3), %s283_s28, 16, %s280_s27, %s270_s30  }
 0x237 PF: > { %s294_s11 = sand.u32 1, %s506_s14   ;;  %p728_p5 = scmp.ne.s32.totalorder %s722_s26, 0 }
 0x238   : > { %p729_p8 = scmp.ge.s32.totalorder %s518_s17, 2  ;;  %s295_s12 = scalar_lea.sflag [#allocation6], %s294_s11 }
 0x23a   : > { %p383_p10 = pnand %p729_p8, %p728_p5 }
 0x23c   : > { %p384_p2 = pneg %p383_p10 }
 0x23e   : > { %501 = dma.done.wait (%p384_p2), %s295_s12, 16  }
 0x23f   : > { %503 = vsyncadd (%p384_p2), %s295_s12, 4294967280  ;;  %p17_p4 = scmp.ge.s32.totalorder %s570_s19, 4   ;;  %s730_s14 = smov %s510_s15 }
 0x240   : > { %s731_s15 = smov %s514_s16  ;;  %s732_s16 = smov %s582_s22 }
 0x241   : > { %s733_s17 = smov %s570_s19  ;;  %19 = sbr.rel (!%p17_p4) target bundleno = 7 (0x7), region = 84 }
 0x246   :  { %299 = vsyncpa [#allocation5], 1 }
 0x247   :  { %301 = vsyncpa [#allocation5 + $0x1], 1 }
 0x248   :  { %302 = vsyncpa [#allocation6], 1 }
 0x249   :  { %304 = vsyncpa [#allocation6 + $0x1], 1 }

</bundles_post_ra>
